<compile_context>
chip_gen: v7x
topology: tpu7x:2x2x1
jax: 0.10.0
libtpu: 0.0.40
codegen_flags: <defaults>
</compile_context>

<pallas_src>
import jax
import jax.numpy as jnp
from jax.experimental import pallas as pl
from jax.experimental.pallas import tpu as pltpu


# ---------------------------------------------------------------------------
# Fused Pallas kernel: (DWSConv + BN + ReLU) x 2, B_tile images per grid step
# ---------------------------------------------------------------------------
def fused_dws_block_kernel(x_ref, m1_ref, m2_ref, bias_ref, out_ref):
    # x_ref    : (B, H, W*Cin)      bf16 input tile (channels folded into lanes)
    # m1_ref   : (3*W*Cin,  W*Cout) bf16 stacked banded weights, BN1 scale folded in
    # m2_ref   : (3*W*Cout, W*Cout) bf16 stacked banded weights, BN2 scale folded in
    # bias_ref : (2, W*Cout)        f32 folded BN biases (row 0: stage 1, row 1: stage 2)
    # out_ref  : (B, H, W*Cout)     f32 lane-dense output tile
    B, H, _ = x_ref.shape
    WCo = out_ref.shape[2]
    BH = B * H

    def shifted_windows(z):
        # z: (B, H, WC) bf16  ->  (B*H, 3*WC) bf16 with columns [x[h-1] | x[h] | x[h+1]].
        # The zero rows inserted at each image's top/bottom edge implement the conv's
        # H-direction zero padding and prevent any bleed between images in the tile.
        WC = z.shape[2]
        zero = jnp.zeros((B, 1, WC), z.dtype)
        up = jnp.concatenate([zero, z[:, : H - 1, :]], axis=1)    # row h sees x[h-1]
        down = jnp.concatenate([z[:, 1:, :], zero], axis=1)       # row h sees x[h+1]
        return jnp.concatenate([up, z, down], axis=2).reshape(BH, 3 * WC)

    def stage(z, m_ref, bias):
        # One merged MXU matmul (K = 3*WC) + folded-BN bias + ReLU, f32 accumulation.
        lhs = shifted_windows(z)                                      # (BH, 3*WC) bf16
        acc = jnp.dot(lhs, m_ref[...], preferred_element_type=jnp.float32)
        return jnp.maximum(acc + bias, 0.0)                           # (BH, WCo) f32

    # ---- stage 1 ------------------------------------------------------------
    y1 = stage(x_ref[...], m1_ref, bias_ref[0:1, :])
    # Intermediate stays on-chip; single f32->bf16 cast feeding stage 2.
    y1b = y1.astype(jnp.bfloat16).reshape(B, H, WCo)

    # ---- stage 2 ------------------------------------------------------------
    y2 = stage(y1b, m2_ref, bias_ref[1:2, :])

    # Lane-dense store: last dim W*Cout (multiple of 128 here) -> unmasked vst.
    out_ref[...] = y2.reshape(B, H, WCo)


# ---------------------------------------------------------------------------
# Wrapper-side parameter folding
# ---------------------------------------------------------------------------
def fold_bn(gamma, beta, mean, var, eps=1e-5):
    scale = gamma / jnp.sqrt(var + eps)
    bias = beta - mean * scale
    return scale, bias


def build_stacked_weight(dw, pw, W, bn_scale):
    """Fold depthwise 3x3 + pointwise 1x1 + BN scale into one (3*W*Ci, W*Co) matrix.

    dw: (3, 3, Ci) depthwise taps; pw: (Ci, Co) pointwise weights; bn_scale: (Co,).
    With the kernel's LHS columns ordered [x[h-1] | x[h] | x[h+1]] (each a folded
    (W*Ci) slab), out[h, v*Co+o] = (LHS[h] @ M)[v*Co+o].  The W-direction zero padding
    of the conv is encoded by the band being truncated at the first/last column blocks;
    all folding is done in f32, the bf16 cast happens at the call site.
    """
    Ci, Co = pw.shape
    pw_scaled = pw.astype(jnp.float32) * bn_scale[None, :].astype(jnp.float32)
    mats = []
    for ky in range(3):
        m = jnp.zeros((W * Ci, W * Co), jnp.float32)
        for kx in range(3):
            # input column-block u feeds output column-block v when u == v + (kx-1)
            shift = jnp.eye(W, k=-(kx - 1), dtype=jnp.float32)
            m = m + jnp.kron(shift, dw[ky, kx][:, None] * pw_scaled)
        mats.append(m)
    return jnp.concatenate(mats, axis=0)          # (3*W*Ci, W*Co)


def _pick_batch_tile(N, max_tile=16):
    """Largest divisor of N that is <= max_tile while keeping >= 2 grid steps
    (so v7x's two TensorCores both get work via dimension_semantics='parallel')."""
    if N <= 1:
        return 1
    best = 1
    for d in range(1, min(max_tile, N // 2) + 1):
        if N % d == 0:
            best = d
    return best


def dws_conv_bottleneck_nhwc(x_nhwc, p, batch_tile=None):
    """Fused DWSConvBottleneck forward on NHWC input. Returns NHWC output."""
    N, H, W, Cin = x_nhwc.shape
    Cout = p["pw1"].shape[1]
    WCi, WCo = W * Cin, W * Cout
    B = batch_tile if batch_tile is not None else _pick_batch_tile(N)
    assert N % B == 0, (N, B)

    s1, b1 = fold_bn(*p["bn1"])
    s2, b2 = fold_bn(*p["bn2"])

    # Banded DWS weights with BN scale folded in (f32 fold, bf16 cast for the MXU).
    m1 = build_stacked_weight(p["dw1"], p["pw1"], W, s1).astype(jnp.bfloat16)  # (3*WCi, WCo)
    m2 = build_stacked_weight(p["dw2"], p["pw2"], W, s2).astype(jnp.bfloat16)  # (3*WCo, WCo)
    # Both stages' BN biases merged into one operand (fewer tiny BlockSpec streams).
    bias = jnp.stack([jnp.tile(b1, W), jnp.tile(b2, W)]).astype(jnp.float32)   # (2, WCo)

    # VMEM guard for the banded-weight formulation (x2 for BlockSpec double-buffering).
    weight_bytes = 2 * (m1.size + m2.size)
    assert 2 * weight_bytes < 16 * 1024 * 1024, (
        "banded-weight path too large for VMEM; switch to channels-last Cout tiling")

    # Fold channels into lanes and cast to bf16 once (halves input HBM->VMEM bytes).
    x_folded = x_nhwc.reshape(N, H, WCi).astype(jnp.bfloat16)

    out = pl.pallas_call(
        fused_dws_block_kernel,
        out_shape=jax.ShapeDtypeStruct((N, H, WCo), jnp.float32),
        grid=(N // B,),
        in_specs=[
            pl.BlockSpec((B, H, WCi), lambda n: (n, 0, 0)),
            pl.BlockSpec((3 * WCi, WCo), lambda n: (0, 0)),
            pl.BlockSpec((3 * WCo, WCo), lambda n: (0, 0)),
            pl.BlockSpec((2, WCo), lambda n: (0, 0)),
        ],
        out_specs=pl.BlockSpec((B, H, WCo), lambda n: (n, 0, 0)),
        compiler_params=pltpu.CompilerParams(
            dimension_semantics=("parallel",),     # megacore sharding on v7x
        ),
    )(x_folded, m1, m2, bias)

    return out.reshape(N, H, W, Cout)


def dws_conv_bottleneck(x_nchw, p, batch_tile=None):
    """DWSConvBottleneck forward with the PyTorch NCHW convention at the edges.

    Inside a full UNet keep activations NHWC end-to-end and call
    dws_conv_bottleneck_nhwc directly — the NCHW<->NHWC transposes here exist only
    for parity with the PyTorch module interface / reference.
    """
    x = jnp.transpose(x_nchw, (0, 2, 3, 1)).astype(jnp.float32)
    y = dws_conv_bottleneck_nhwc(x, p, batch_tile=batch_tile)
    return jnp.transpose(y, (0, 3, 1, 2))


# ---------------------------------------------------------------------------
# Parameter init (PyTorch layouts -> kernel layouts)
# ---------------------------------------------------------------------------
def init_params(key, in_channels, out_channels):
    ks = jax.random.split(key, 12)
    p = {}
    # DWS 1: depthwise (Cin,1,3,3) -> (3,3,Cin); pointwise (Cout,Cin,1,1) -> (Cin,Cout)
    dw1 = jax.random.normal(ks[0], (in_channels, 1, 3, 3), jnp.float32) * 0.2
    pw1 = jax.random.normal(ks[1], (out_channels, in_channels, 1, 1), jnp.float32) * 0.2
    p["dw1"] = jnp.transpose(dw1[:, 0], (1, 2, 0))
    p["pw1"] = jnp.transpose(pw1[:, :, 0, 0], (1, 0))
    p["bn1"] = (jax.random.normal(ks[2], (out_channels,)) * 0.1 + 1.0,            # gamma
                jax.random.normal(ks[3], (out_channels,)) * 0.1,                   # beta
                jax.random.normal(ks[4], (out_channels,)) * 0.1,                   # running_mean
                jnp.abs(jax.random.normal(ks[5], (out_channels,))) * 0.5 + 0.5)    # running_var
    # DWS 2
    dw2 = jax.random.normal(ks[6], (out_channels, 1, 3, 3), jnp.float32) * 0.2
    pw2 = jax.random.normal(ks[7], (out_channels, out_channels, 1, 1), jnp.float32) * 0.2
    p["dw2"] = jnp.transpose(dw2[:, 0], (1, 2, 0))
    p["pw2"] = jnp.transpose(pw2[:, :, 0, 0], (1, 0))
    p["bn2"] = (jax.random.normal(ks[8], (out_channels,)) * 0.1 + 1.0,
                jax.random.normal(ks[9], (out_channels,)) * 0.1,
                jax.random.normal(ks[10], (out_channels,)) * 0.1,
                jnp.abs(jax.random.normal(ks[11], (out_channels,))) * 0.5 + 0.5)
    return p


# ---------------------------------------------------------------------------
# Pure-JAX f32 reference (mirrors the PyTorch forward, eval-mode BN)
# ---------------------------------------------------------------------------
def _ref_forward(x_nchw, p):
    def conv_dw(x, w33c):  # (3,3,C) -> OIHW (C,1,3,3), groups=C
        w = jnp.transpose(w33c, (2, 0, 1))[:, None]
        return jax.lax.conv_general_dilated(
            x, w, (1, 1), ((1, 1), (1, 1)),
            feature_group_count=x.shape[1],
            dimension_numbers=("NCHW", "OIHW", "NCHW"))

    def conv_pw(x, w_io):  # (Cin,Cout) -> OIHW (Cout,Cin,1,1)
        w = jnp.transpose(w_io, (1, 0))[:, :, None, None]
        return jax.lax.conv_general_dilated(
            x, w, (1, 1), "VALID",
            dimension_numbers=("NCHW", "OIHW", "NCHW"))

    def bn(x, params, eps=1e-5):
        g, b, m, v = params
        s = g / jnp.sqrt(v + eps)
        return x * s[None, :, None, None] + (b - m * s)[None, :, None, None]

    y = conv_pw(conv_dw(x_nchw, p["dw1"]), p["pw1"])
    y = jax.nn.relu(bn(y, p["bn1"]))
    y = conv_pw(conv_dw(y, p["dw2"]), p["pw2"])
    y = jax.nn.relu(bn(y, p["bn2"]))
    return y


if __name__ == "__main__":
    key = jax.random.PRNGKey(0)
    k_x, k_p, k_x2 = jax.random.split(key, 3)

    # Primary check: PyTorch-style NCHW input at the module's small shapes.
    N, C_in, C_out, H, W = 2, 4, 8, 16, 16
    x = jax.random.normal(k_x, (N, C_in, H, W), jnp.float32)
    params = init_params(k_p, C_in, C_out)

    out = dws_conv_bottleneck(x, params)          # B_tile=1, grid=(2,) (v7x: 2 TC steps)
    out = jax.block_until_ready(out)
    ref = _ref_forward(x, params)
    assert out.shape == (N, C_out, H, W), out.shape
    err = float(jnp.max(jnp.abs(out - ref)))
    # bf16 MXU operands -> tolerance loosened vs. the pure-f32 reference.
    assert jnp.allclose(out, ref, rtol=2e-2, atol=2e-2), err

    # Secondary check: exercises the batched path (B_tile=4, grid=(2,)).
    N2 = 8
    x2 = jax.random.normal(k_x2, (N2, C_in, H, W), jnp.float32)
    out2 = jax.block_until_ready(dws_conv_bottleneck(x2, params))
    ref2 = _ref_forward(x2, params)
    err2 = float(jnp.max(jnp.abs(out2 - ref2)))
    assert jnp.allclose(out2, ref2, rtol=2e-2, atol=2e-2), err2

    print("KERNEL_OK")
</pallas_src>

<mosaic_0001>
module attributes {stable_mosaic.version = 11 : i64} {
  func.func @fused_dws_block_kernel(%arg0: i32, %arg1: memref<1x16x64xbf16, #tpu.memory_space<vmem>>, %arg2: memref<192x128xbf16, #tpu.memory_space<vmem>>, %arg3: memref<384x128xbf16, #tpu.memory_space<vmem>>, %arg4: memref<2x128xf32, #tpu.memory_space<vmem>>, %arg5: memref<1x16x128xf32, #tpu.memory_space<vmem>>) attributes {dimension_semantics = [#tpu.dimension_semantics<parallel>], iteration_bounds = array<i64: 2>, scalar_prefetch = 0 : i64, scratch_operands = 0 : i64, tpu.core_type = #tpu.core_type<tc>, window_params = [{transform_indices = @transform_0, window_bounds = array<i64: 1, 16, 64>}, {pipeline_mode = #tpu.pipeline_mode<synchronous>, transform_indices = @transform_1, window_bounds = array<i64: 192, 128>}, {pipeline_mode = #tpu.pipeline_mode<synchronous>, transform_indices = @transform_2, window_bounds = array<i64: 384, 128>}, {pipeline_mode = #tpu.pipeline_mode<synchronous>, transform_indices = @transform_3, window_bounds = array<i64: 2, 128>}, {transform_indices = @transform_4, window_bounds = array<i64: 1, 16, 128>}]} {
    %c0 = arith.constant 0 : index
    %c0_0 = arith.constant 0 : index
    %c0_1 = arith.constant 0 : index
    %0 = vector.load %arg1[%c0, %c0_0, %c0_1] : memref<1x16x64xbf16, #tpu.memory_space<vmem>>, vector<1x16x64xbf16>
    %c0_2 = arith.constant 0 : index
    %c0_3 = arith.constant 0 : index
    %1 = vector.load %arg4[%c0_2, %c0_3] : memref<2x128xf32, #tpu.memory_space<vmem>>, vector<1x128xf32>
    %cst = arith.constant 0.000000e+00 : bf16
    %2 = vector.broadcast %cst : bf16 to vector<1x1x64xbf16>
    %3 = vector.extract_strided_slice %0 {offsets = [0, 0, 0], sizes = [1, 15, 64], strides = [1, 1, 1]} : vector<1x16x64xbf16> to vector<1x15x64xbf16>
    %4 = tpu.concatenate %2, %3 in 1 : vector<1x1x64xbf16>, vector<1x15x64xbf16> -> vector<1x16x64xbf16>
    %5 = vector.extract_strided_slice %0 {offsets = [0, 1, 0], sizes = [1, 15, 64], strides = [1, 1, 1]} : vector<1x16x64xbf16> to vector<1x15x64xbf16>
    %6 = tpu.concatenate %5, %2 in 1 : vector<1x15x64xbf16>, vector<1x1x64xbf16> -> vector<1x16x64xbf16>
    %7 = tpu.concatenate %4, %0, %6 in 2 : vector<1x16x64xbf16>, vector<1x16x64xbf16>, vector<1x16x64xbf16> -> vector<1x16x192xbf16>
    %8 = vector.shape_cast %7 : vector<1x16x192xbf16> to vector<16x192xbf16>
    %c0_4 = arith.constant 0 : index
    %c0_5 = arith.constant 0 : index
    %9 = vector.load %arg2[%c0_4, %c0_5] : memref<192x128xbf16, #tpu.memory_space<vmem>>, vector<192x128xbf16>
    %cst_6 = arith.constant dense<0.000000e+00> : vector<16x128xf32>
    %10 = tpu.matmul %8, %9, %cst_6 {dimension_numbers = #tpu.dot_dimension_numbers<[1], [0], [0], [1], [0, 0, 1, 1], [], []>} : vector<16x192xbf16>, vector<192x128xbf16>, vector<16x128xf32> -> vector<16x128xf32>
    %11 = vector.broadcast %1 : vector<1x128xf32> to vector<16x128xf32>
    %12 = arith.addf %10, %11 : vector<16x128xf32>
    %cst_7 = arith.constant 0.000000e+00 : f32
    %13 = vector.broadcast %cst_7 : f32 to vector<16x128xf32>
    %14 = arith.maximumf %12, %13 : vector<16x128xf32>
    %15 = arith.truncf %14 : vector<16x128xf32> to vector<16x128xbf16>
    %16 = vector.shape_cast %15 : vector<16x128xbf16> to vector<1x16x128xbf16>
    %c1 = arith.constant 1 : index
    %c0_8 = arith.constant 0 : index
    %17 = vector.load %arg4[%c1, %c0_8] : memref<2x128xf32, #tpu.memory_space<vmem>>, vector<1x128xf32>
    %cst_9 = arith.constant 0.000000e+00 : bf16
    %18 = vector.broadcast %cst_9 : bf16 to vector<1x1x128xbf16>
    %19 = vector.extract_strided_slice %16 {offsets = [0, 0, 0], sizes = [1, 15, 128], strides = [1, 1, 1]} : vector<1x16x128xbf16> to vector<1x15x128xbf16>
    %20 = tpu.concatenate %18, %19 in 1 : vector<1x1x128xbf16>, vector<1x15x128xbf16> -> vector<1x16x128xbf16>
    %21 = vector.extract_strided_slice %16 {offsets = [0, 1, 0], sizes = [1, 15, 128], strides = [1, 1, 1]} : vector<1x16x128xbf16> to vector<1x15x128xbf16>
    %22 = tpu.concatenate %21, %18 in 1 : vector<1x15x128xbf16>, vector<1x1x128xbf16> -> vector<1x16x128xbf16>
    %23 = tpu.concatenate %20, %16, %22 in 2 : vector<1x16x128xbf16>, vector<1x16x128xbf16>, vector<1x16x128xbf16> -> vector<1x16x384xbf16>
    %24 = vector.shape_cast %23 : vector<1x16x384xbf16> to vector<16x384xbf16>
    %c0_10 = arith.constant 0 : index
    %c0_11 = arith.constant 0 : index
    %25 = vector.load %arg3[%c0_10, %c0_11] : memref<384x128xbf16, #tpu.memory_space<vmem>>, vector<384x128xbf16>
    %cst_12 = arith.constant dense<0.000000e+00> : vector<16x128xf32>
    %26 = tpu.matmul %24, %25, %cst_12 {dimension_numbers = #tpu.dot_dimension_numbers<[1], [0], [0], [1], [0, 0, 1, 1], [], []>} : vector<16x384xbf16>, vector<384x128xbf16>, vector<16x128xf32> -> vector<16x128xf32>
    %27 = vector.broadcast %17 : vector<1x128xf32> to vector<16x128xf32>
    %28 = arith.addf %26, %27 : vector<16x128xf32>
    %cst_13 = arith.constant 0.000000e+00 : f32
    %29 = vector.broadcast %cst_13 : f32 to vector<16x128xf32>
    %30 = arith.maximumf %28, %29 : vector<16x128xf32>
    %31 = vector.shape_cast %30 : vector<16x128xf32> to vector<1x16x128xf32>
    %c0_14 = arith.constant 0 : index
    %c0_15 = arith.constant 0 : index
    %c0_16 = arith.constant 0 : index
    %32 = vector.load %arg5[%c0_14, %c0_15, %c0_16] : memref<1x16x128xf32, #tpu.memory_space<vmem>>, vector<1x16x128xf32>
    tpu.vector_store %arg5[%c0_14, %c0_15, %c0_16], %31 {strides = array<i32>} : memref<1x16x128xf32, #tpu.memory_space<vmem>>, vector<1x16x128xf32>,
    return
  }
  func.func @transform_0(%arg0: i32) -> (i32, i32, i32) {
    %c0_i32 = arith.constant 0 : i32
    %c0_i32_0 = arith.constant 0 : i32
    %c0_i32_1 = arith.constant 0 : i32
    return %arg0, %c0_i32, %c0_i32_0 : i32, i32, i32
  }
  func.func @transform_1(%arg0: i32) -> (i32, i32) {
    %c0_i32 = arith.constant 0 : i32
    %c0_i32_0 = arith.constant 0 : i32
    %c0_i32_1 = arith.constant 0 : i32
    return %c0_i32, %c0_i32_0 : i32, i32
  }
  func.func @transform_2(%arg0: i32) -> (i32, i32) {
    %c0_i32 = arith.constant 0 : i32
    %c0_i32_0 = arith.constant 0 : i32
    %c0_i32_1 = arith.constant 0 : i32
    return %c0_i32, %c0_i32_0 : i32, i32
  }
  func.func @transform_3(%arg0: i32) -> (i32, i32) {
    %c0_i32 = arith.constant 0 : i32
    %c0_i32_0 = arith.constant 0 : i32
    %c0_i32_1 = arith.constant 0 : i32
    return %c0_i32, %c0_i32_0 : i32, i32
  }
  func.func @transform_4(%arg0: i32) -> (i32, i32, i32) {
    %c0_i32 = arith.constant 0 : i32
    %c0_i32_0 = arith.constant 0 : i32
    %c0_i32_1 = arith.constant 0 : i32
    return %arg0, %c0_i32, %c0_i32_0 : i32, i32, i32
  }
}

</mosaic_0001>

<bundles_post_ra>
// kernel: tpu_custom_call.1
= control target key start
LH: loop header
LB: loop body
LE: loop exit
PB: predicated region body
PF: predicated region fallthrough
CT: control target
= control target key end

     0   :  { %9 = vsyncpa [#allocation3], 0  ;;  %s1527_s0 = inlined_call_operand.hbm [shape: bf16[2,16,64], index: 0, kind: input, shape index: {}]   ;;  %s1528_s1 = inlined_call_operand.hbm [shape: bf16[192,128], index: 1, kind: input, shape index: {}]   ;;  %s1529_s2 = inlined_call_operand.hbm [shape: bf16[384,128], index: 2, kind: input, shape index: {}]   ;;  %s1530_s3 = inlined_call_operand.vmem [shape: f32[2,128], index: 3, kind: input, shape index: {}]   ;;  %s1531_s4 = inlined_call_operand.hbm [shape: f32[2,16,128], index: 4, kind: output, shape index: {}]  }
   0x1   :  { %11 = vsyncpa [#allocation3 + $0x1], 0 }
   0x2   :  { %12 = vsyncpa [#allocation6], 0 }
   0x3   :  { %13 = vsyncpa [#allocation4], 0 }
   0x4   :  { %15 = vsyncpa [#allocation4 + $0x1], 0  ;;  %s1247_s15 = smov 0   ;;  %s1249_s16 = smov 0  }
   0x5   :  { %s1251_s17 = smov 0   ;;  %s1253_s18 = smov 0  }
   0x6 LB: > { %s1268_s19 = sadd.s32 4294967295, %s1208_s18   ;;  %s829_s20 = sadd.s32 4294967294, %s1208_s18   ;;  %s1208_s18 = sphi %s1253_s18, %s1555_s18   ;;  %s1204_s17 = sphi %s1251_s17, %s1554_s17   ;;  %s1200_s16 = sphi %s1249_s16, %s1553_s16   ;;  %s1196_s15 = sphi %s1247_s15, %s1552_s15  }
   0x7   : > { %p41_p0 = scmp.ne.s32.totalorder %s1200_s16, %s1196_s15  ;;  %p1532_p1 = scmp.eq.s32.totalorder %s1268_s19, 0 }
   0x8   : > { %p134_p3 = scmp.eq.s32.totalorder %s829_s20, 1  ;;  %p830_p5 = scmp.ge.s32.totalorder %s1208_s18, 1 }
   0x9   : > { %p1277_p4 = por %p1532_p1, %p41_p0  ;;  %p141_p7 = scmp.lt.s32.totalorder %s1208_s18, 3 }
   0xa   : > { %p1282_p6 = por %p134_p3, %p41_p0  ;;  %s1210_s24 = smov [#allocation5]  }
   0xb   : > { %s1535_s21 = scalar_select %p1277_p4, 1, 0 }
   0xc   : > { %s1536_s22 = scalar_select %p1282_p6, 1, 0 }
   0xd   : > { %p1287_p8 = pnand %p830_p5, %p141_p7  ;;  %s153_s25 = sshll.u32 %s1210_s24, 4  ;;  %s1291_s25 = int_to_ptr.vmem [resolvable:$true] %s153_s25 }
   0xe   : > { %s1211_s27 = smov [#allocation7]   ;;  %s1052_s5 = scalar_lea.hbm %s1528_s1, 1536 }
   0xf   : > { %p952_p9 = pneg %p1287_p8  ;;  %s166_s28 = sshll.u32 %s1211_s27, 4  ;;  %s1302_s28 = int_to_ptr.vmem [resolvable:$true] %s166_s28 }
  0x10   : > { %p1053_p12 = scmp.ne.s32.totalorder %s1528_s1, %s1052_s5  ;;  %p1059_p5 = scmp.lt.u32.totalorder %s1052_s5, %s1528_s1 }
  0x11   : > { %p1298_p11 = pnand %p952_p9, %p1532_p1 }
  0x13   : > { %p1054_p13 = pneg %p1298_p11 }
  0x15   : > { %p1055_p0 = pnand %p1054_p13, %p1053_p12 }
  0x17   : > { %p1056_p3 = pneg %p1055_p0 }
  0x19   : > { %p1061_p7 = pnand %p1059_p5, %p1056_p3 }
  0x1b   : > { %1064 = shalt.err (!%p1061_p7)
}
  0x1c   : > { %s1065_s10 = scalar_lea.vmem %s1291_s25, 1536  ;;  %p1073_p2 = scmp.lt.s32.totalorder %s1291_s25, %s1291_s25 }
  0x1d   : > { %p1066_p9 = scmp.ne.s32.totalorder %s1291_s25, %s1065_s10  ;;  %p1074_p12 = scmp.lt.s32.totalorder %s1065_s10, %s1065_s10 }
  0x1f   : > { %p1068_p10 = pnand %p1066_p9, %p1054_p13  ;;  %p1075_p0 = por %p1074_p12, %p1073_p2 }
  0x21   : > { %p1069_p1 = pneg %p1068_p10 }
  0x23   : > { %p1076_p6 = pnand %p1075_p0, %p1069_p1 }
  0x25   : > { %1079 = shalt.err (!%p1076_p6)
}
  0x26   : > { %s1212_s11 = smov 64   ;;  %s1213_s12 = smov 4  }
  0x27   : > { %955 = dma.hbm_to_vmem [thread:$0]  (!%p1298_p11), %s1528_s1, 1536, %s1291_s25, [#allocation6], %s1212_s11, %s1212_s11, %s1213_s12  }
  0x28   : > { %s1080_s27 = scalar_lea.hbm %s1529_s2, 3072 }
  0x29   : > { %p1081_p1 = scmp.ne.s32.totalorder %s1529_s2, %s1080_s27  ;;  %p1087_p10 = scmp.lt.u32.totalorder %s1080_s27, %s1529_s2 }
  0x2b   : > { %p1083_p2 = pnand %p1081_p1, %p1054_p13 }
  0x2d   : > { %p1084_p6 = pneg %p1083_p2 }
  0x2f   : > { %p1089_p3 = pnand %p1087_p10, %p1084_p6 }
  0x31   : > { %1092 = shalt.err (!%p1089_p3)
}
  0x32   : > { %s1093_s25 = scalar_lea.vmem %s1302_s28, 3072  ;;  %p1101_p12 = scmp.lt.s32.totalorder %s1302_s28, %s1302_s28 }
  0x33   : > { %p1094_p5 = scmp.ne.s32.totalorder %s1302_s28, %s1093_s25  ;;  %p1102_p0 = scmp.lt.s32.totalorder %s1093_s25, %s1093_s25 }
  0x35   : > { %p1096_p7 = pnand %p1094_p5, %p1054_p13  ;;  %p1103_p1 = por %p1102_p0, %p1101_p12 }
  0x37   : > { %p1097_p9 = pneg %p1096_p7 }
  0x39   : > { %p1104_p2 = pnand %p1103_p1, %p1097_p9 }
  0x3b   : > { %1107 = shalt.err (!%p1104_p2)
}
  0x3c   : > { %958 = dma.hbm_to_vmem [thread:$0]  (!%p1298_p11), %s1529_s2, 3072, %s1302_s28, [#allocation6], %s1212_s11, %s1212_s11, %s1213_s12  }
  0x3d   : > { %s1363_s26 = sadd.s32 1, %s1208_s18   ;;  %s28_s9 = sadd.s32 1, %s1204_s17 }
  0x3e   : > { %s25_s10 = ssub.s32 %s1208_s18, %s1363_s26  ;;  %p35_p13 = scmp.ne.s32.totalorder %s1204_s17, %s1200_s16 }
  0x3f   : > { %p26_p6 = scmp.eq.s32.totalorder %s25_s10, 0  ;;  %p36_p10 = scmp.eq.s32.totalorder %s1208_s18, 0 }
  0x40   : > { %p1539_p3 = scmp.eq.s32.totalorder %s1268_s19, 1  ;;  %p969_p7 = scmp.lt.s32.totalorder %s1208_s18, 2 }
  0x41   : > { %s1379_s14 = scalar_select %p26_p6, %s1204_s17, %s28_s9  }
  0x42   : > { %p1373_p5 = por %p1539_p3, %p35_p13  ;;  %p37_p9 = por %p36_p10, %p35_p13 }
  0x43   : > { %s183_s20 = sand.u32 1, %s1204_s17   ;;  %s887_s28 = sshll.u32 %s1208_s18, 7 }
  0x44   : > { %s1540_s13 = scalar_select %p1373_p5, 1, 0 }
  0x45   : > { %s834_s24 = sshll.u32 %s183_s20, 3  ;;  %s1386_s30 = scalar_lea.hbm %s1527_s0, %s887_s28 }
  0x46   : > { %s187_s5 = scalar_lea.vmem [#allocation2], %s834_s24  ;;  %p1390_p11 = pnand %p969_p7, %p37_p9 }
  0x47   : > { %s194_s6 = sshll.u32 %s187_s5, 4  ;;  %s1394_s7 = scalar_lea.sflag [#allocation3], %s183_s20  ;;  %s1388_s6 = int_to_ptr.vmem [resolvable:$true] %s194_s6 }
  0x48   : > { %s1108_s8 = scalar_lea.hbm %s1386_s30, 128  ;;  %p1110_p0 = pneg %p1390_p11 }
  0x49   : > { %p1109_p12 = scmp.ne.s32.totalorder %s1386_s30, %s1108_s8  ;;  %s1113_s24 = scalar_lea.hbm %s1527_s0, 256 }
  0x4a   : > { %p1114_p13 = scmp.lt.u32.totalorder %s1386_s30, %s1527_s0  ;;  %p1115_p6 = scmp.lt.u32.totalorder %s1113_s24, %s1108_s8 }
  0x4b   : > { %p1111_p1 = pnand %p1110_p0, %p1109_p12  ;;  %p1117_p3 = scmp.lt.u32.totalorder %s1108_s8, %s1386_s30 }
  0x4c   : > { %p1116_p10 = por %p1115_p6, %p1114_p13 }
  0x4d   : > { %p1112_p2 = pneg %p1111_p1 }
  0x4e   : > { %p1118_p7 = por %p1117_p3, %p1116_p10 }
  0x50   : > { %p1119_p9 = pnand %p1118_p7, %p1112_p2 }
  0x52   : > { %1122 = shalt.err (!%p1119_p9)
}
  0x53   : > { %s1123_s20 = scalar_lea.vmem %s1388_s6, 128  ;;  %s1214_s29 = smov [#allocation2]  }
  0x54   : > { %p1124_p12 = scmp.ne.s32.totalorder %s1388_s6, %s1123_s20  ;;  %s1128_s5 = sshll.u32 %s1214_s29, 4  ;;  %s1129_s5 = int_to_ptr.vmem [resolvable:$false] %s1128_s5 }
  0x55   : > { %s1130_s9 = scalar_lea.vmem %s1129_s5, 256  ;;  %p1131_p4 = scmp.lt.s32.totalorder %s1388_s6, %s1129_s5 }
  0x56   : > { %p1126_p1 = pnand %p1124_p12, %p1110_p0  ;;  %p1132_p13 = scmp.lt.s32.totalorder %s1130_s9, %s1123_s20 }
  0x58   : > { %p1127_p5 = pneg %p1126_p1  ;;  %p1133_p6 = por %p1132_p13, %p1131_p4 }
  0x5a   : > { %p1134_p10 = pnand %p1133_p6, %p1127_p5 }
  0x5c   : > { %1137 = shalt.err (!%p1134_p10)
}
  0x5d   : > { %962 = dma.hbm_to_vmem [thread:$0]  (!%p1390_p11), %s1386_s30, 128, %s1388_s6, %s1394_s7, %s1212_s11, %s1212_s11, %s1213_s12  }
  0x5e   : > { %206 = sbr.rel (%p1287_p8) target bundleno = 714 (0x2ca), region = 36  ;;  %s1428_s8 = sand.u32 (!%p1287_p8), 1, %s1200_s16  }
  0x5f   : > { %s838_s10 = sshll.u32 (!%p1287_p8), %s1428_s8, 3  ;;  %s209_s24 = scalar_lea.sflag (!%p1287_p8), [#allocation3], %s1428_s8 }
  0x60   : > { %s212_s28 = scalar_lea.vmem (!%p1287_p8), [#allocation2], %s838_s10  ;;  %p1542_p4 = scmp.ne.s32.totalorder (!%p1287_p8), %s1535_s21, 0 }
  0x65   : > { %1183 = dma.done.wait (%p1542_p4), %s209_s24, 128  }
  0x66   : > { %1185 = vsyncadd (%p1542_p4), %s209_s24, 4294967168  ;;  %p1543_p5 = scmp.eq.s32.totalorder %s1268_s19, 0 }
  0x68   : > { %1187 = dma.done.wait (%p1543_p5), [#allocation6], 4608   ;;  %p1544_p11 = pmov %p1543_p5 }
  0x69   : > { %v1215_v0 = vmov 0   ;;  %vm270_vm0 = vsmask.f32 7424  ;;  %v1015_v1 = vld [vmem:[%s212_s28] sm:$0xff]   ;;  %v1016_v2 = vld [vmem:[#allocation5] sm:$0xff]   ;;  %s1216_s23 = smov 64  }
  0x6a   : > { %1189 = vsyncadd (%p1544_p11), [#allocation6], 4294962688  ;;  %383 = vmatprep.subr.bf16.mxu0 %v1215_v0  ;;  %273 = vrot.lane.b32.xlu0 %v1015_v1, %s1216_s23  ;;  %v255_v3 = vshrl.u32 %v1015_v1, 16  ;;  %vm269_vm1 = vcmask 1047552   ;;  %v1017_v4 = vld [vmem:[#allocation5 + $0x8] sm:$0xff]   ;;  %v258_v5 = vshll.u32 %v1015_v1, 16 }
  0x6b   : > { %384 = vmatpush1.bf16.msra.mxu0 %v1016_v2  ;;  %vm1442_vm2 = vmand %vm269_vm1, %vm270_vm0  ;;  %v1018_v10 = vld [vmem:[#allocation5 + $0x10] sm:$0xff]   ;;  %vm275_vm3 = vcmask 523264   ;;  %v1019_v13 = vld [vmem:[#allocation5 + $0x18] sm:$0xff]   ;;  %vm262_vm4 = vcmask 1040384   ;;  %vm263_vm5 = vsmask.f32 256 }
  0x6c   : > { %385 = vmatprep.subr.bf16.mxu0 %v1215_v0  ;;  %v257_v6 = vrot.slane %v255_v3, 7  ;;  %v266_v7 = vrot.slane %v258_v5, 1  ;;  %v1020_v14 = vld [vmem:[#allocation5 + $0x20] sm:$0xff]   ;;  %v1030_v17 = vld [vmem:[#allocation7 + $0x48] sm:$0xff]   ;;  %v1032_v19 = vld [vmem:[#allocation7 + $0x50] sm:$0xff]   ;;  %v1217_v42 = vmov 0.0  }
  0x6d   : > { %v1028_v15 = vld [vmem:[#allocation7 + $0x40] sm:$0xff]   ;;  %v1031_v18 = vld [vmem:[#allocation7 + $0x8] sm:$0xff]   ;;  %v1033_v21 = vld [vmem:[#allocation7 + $0x10] sm:$0xff]   ;;  %vm1218_vm7 = vmmov 0   ;;  %s841_s12 = sshll.u32 %s1428_s8, 4  ;;  %s888_s27 = sshll.u32 %s1268_s19, 8 }
  0x6e   : > { %v260_v9 = vor.u32 %v258_v5, %v257_v6  ;;  %v267_v11 = vor.u32 %v266_v7, %v255_v3  ;;  %v1029_v16 = vld [vmem:[#allocation7] sm:$0xff]   ;;  %889 = vmatprep.subr.bf16.mxu1 %v1028_v15  ;;  %v1021_v20 = vld [vmem:[#allocation5 + $0x28] sm:$0xff]   ;;  %v1022_v22 = vld [vmem:[#allocation5 + $0x30] sm:$0xff]   ;;  %s244_s25 = scalar_lea.vmem [#allocation8], %s841_s12  ;;  %s1483_s5 = scalar_lea.hbm %s1531_s4, %s888_s27 }
  0x6f   : > { %386 = vmatpush1.bf16.msra.mxu0 %v1017_v4  ;;  %890 = vmatpush3.bf16.msra.mxu1 %v1029_v16  ;;  %v1034_v23 = vld [vmem:[#allocation7 + $0x58] sm:$0xff]   ;;  %v1036_v25 = vld [vmem:[#allocation7 + $0x60] sm:$0xff]   ;;  %v1025_v28 = vld [vmem:[#allocation5 + $0x48] sm:$0xff]   ;;  %s737_s7 = sshll.u32 %s244_s25, 4  ;;  %s724_s9 = scalar_lea.sflag [#allocation4], %s1428_s8  ;;  %s1478_s7 = int_to_ptr.vmem [resolvable:$true] %s737_s7 }
  0x70   : > { %387 = vmatprep.subr.bf16.mxu0 %v1215_v0  ;;  %v272_v12 = vsel %vm1442_vm2, %v267_v11, 0  ;;  %891 = vmatprep.subr.bf16.mxu1 %v1030_v17  ;;  %v1035_v24 = vld [vmem:[#allocation7 + $0x18] sm:$0xff]   ;;  %v1024_v27 = vld [vmem:[#allocation5 + $0x40] sm:$0xff]   ;;  %v1026_v29 = vld [vmem:[#allocation5 + $0x50] sm:$0xff]   ;;  %s1138_s10 = scalar_lea.vmem %s1478_s7, 256  ;;  %p1549_p0 = scmp.ne.s32.totalorder %s1540_s13, 0 }
  0x71   : > { %856 = vmatprep.mubr.msk.bf16.mxu0 %vm275_vm3, %v272_v12  ;;  %v1023_v26 = vld [vmem:[#allocation5 + $0x38] sm:$0xff]   ;;  %vm1459_vm6 = vmand %vm262_vm4, %vm263_vm5  ;;  %v1037_v35 = vld [vmem:[#allocation7 + $0x20] sm:$0xff]   ;;  %p1139_p8 = scmp.ne.s32.totalorder %s1478_s7, %s1138_s10  ;;  %s1219_s19 = smov [#allocation8]  }
  0x72   : > { %v1027_v30 = vld [vmem:[#allocation5 + $0x58] sm:$0xff]   ;;  %v265_v32 = vsel %vm1459_vm6, 0, %v260_v9  ;;  %v1038_v36 = vld [vmem:[#allocation7 + $0x68] sm:$0xff]   ;;  %v1040_v38 = vld [vmem:[#allocation7 + $0x70] sm:$0xff]   ;;  %s1142_s24 = sshll.u32 %s1219_s19, 4  ;;  %s1143_s24 = int_to_ptr.vmem [resolvable:$false] %s1142_s24 }
  0x73   : > { %388 = vmatpush1.bf16.msra.mxu0 %v1018_v10  ;;  %892 = vmatpush3.bf16.msra.mxu1 %v1031_v18  ;;  %v1039_v37 = vld [vmem:[#allocation7 + $0x28] sm:$0xff]   ;;  %v1041_v39 = vld [vmem:[#allocation7 + $0x30] sm:$0xff]   ;;  %v1042_v40 = vld [vmem:[#allocation7 + $0x78] sm:$0xff]   ;;  %p1140_p2 = pnand %p1139_p8, %p1549_p0  ;;  %s1144_s28 = scalar_lea.vmem %s1143_s24, 512 }
  0x74   : > { %389 = vmatprep.subr.bf16.mxu0 %v1215_v0  ;;  %893 = vmatprep.subr.bf16.mxu1 %v1032_v19  ;;  %v1043_v41 = vld [vmem:[#allocation7 + $0x38] sm:$0xff]   ;;  %v843_v43 = vld [vmem:[%s1530_s3] ss:$0 sm:$0xff]  ;;  %v1044_v57 = vld [vmem:[#allocation7 + $0x80] sm:$0xff]   ;;  %p1145_p7 = scmp.lt.s32.totalorder %s1478_s7, %s1143_s24  ;;  %p1146_p9 = scmp.lt.s32.totalorder %s1144_s28, %s1138_s10 }
  0x75   : > { %v1045_v59 = vld [vmem:[#allocation7 + $0x88] sm:$0xff]   ;;  %v1046_v60 = vld [vmem:[#allocation7 + $0x90] sm:$0xff]   ;;  %v1047_v61 = vld [vmem:[#allocation7 + $0x98] sm:$0xff]   ;;  %p1141_p3 = pneg %p1140_p2 }
  0x76   : > { %v1048_v62 = vld [vmem:[#allocation7 + $0xa0] sm:$0xff]   ;;  %v1049_v63 = vld [vmem:[#allocation7 + $0xa8] sm:$0xff]   ;;  %v1051_v2 = vld [vmem:[#allocation7 + $0xb8] sm:$0xff]   ;;  %p1147_p12 = por %p1146_p9, %p1145_p7 }
  0x77   : > { %390 = vmatpush1.bf16.msra.mxu0 %v1019_v13  ;;  %894 = vmatpush3.bf16.msra.mxu1 %v1033_v21  ;;  %v857_v12 = vld [vmem:[%s1530_s3 + $0x1] ss:$0 sm:$0xff] }
  0x78   : > { %391 = vmatprep.subr.bf16.mxu0 %v1215_v0  ;;  %895 = vmatprep.subr.bf16.mxu1 %v1034_v23  ;;  %p1148_p1 = pnand %p1147_p12, %p1141_p3 }
  0x7b   : > { %392 = vmatpush1.bf16.msra.mxu0 %v1020_v14  ;;  %896 = vmatpush3.bf16.msra.mxu1 %v1035_v24 }
  0x7c   : > { %393 = vmatprep.subr.bf16.mxu0 %v1215_v0  ;;  %897 = vmatprep.subr.bf16.mxu1 %v1036_v25 }
  0x7f   : > { %394 = vmatpush1.bf16.msra.mxu0 %v1021_v20  ;;  %898 = vmatpush3.bf16.msra.mxu1 %v1037_v35 }
  0x80   : > { %395 = vmatprep.subr.bf16.mxu0 %v1215_v0  ;;  %899 = vmatprep.subr.bf16.mxu1 %v1038_v36 }
  0x83   : > { %396 = vmatpush1.bf16.msra.mxu0 %v1022_v22  ;;  %900 = vmatpush3.bf16.msra.mxu1 %v1039_v37 }
  0x84   : > { %397 = vmatprep.subr.bf16.mxu0 %v1215_v0  ;;  %901 = vmatprep.subr.bf16.mxu1 %v1040_v38 }
  0x87   : > { %398 = vmatpush1.bf16.msra.mxu0 %v1023_v26  ;;  %902 = vmatpush3.bf16.msra.mxu1 %v1041_v39 }
  0x88   : > { %399 = vmatprep.subr.bf16.mxu0 %v1215_v0  ;;  %903 = vmatprep.subr.bf16.mxu1 %v1042_v40 }
  0x8b   : > { %400 = vmatpush1.bf16.msra.mxu0 %v1024_v27  ;;  %904 = vmatpush3.bf16.msra.mxu1 %v1043_v41 }
  0x8c   : > { %401 = vmatprep.subr.bf16.mxu0 %v1215_v0  ;;  %920 = vmatprep.subr.bf16.mxu1 %v1217_v42 }
  0x8f   : > { %402 = vmatpush1.bf16.msra.mxu0 %v1025_v28 }
  0x90   : > { %403 = vmatprep.subr.bf16.mxu0 %v1215_v0 }
  0x93   : > { %404 = vmatpush1.bf16.msra.mxu0 %v1026_v29 }
  0x94   : > { %405 = vmatprep.subr.bf16.mxu0 %v1215_v0  ;;  %v1050_v0 = vld [vmem:[#allocation7 + $0xb0] sm:$0xff]  }
  0x97   : > { %406 = vmatpush1.bf16.msra.mxu0 %v1027_v30 }
  0xdc   : > { %v274_v33 = vpop.permute.xlu0 %273 }
  0xdd   : > { %v278_v34 = vsel %vm275_vm3, %v265_v32, %v274_v33 }
  0xde   : > { %416 = vmatmul.mubr.bf16.vlgmr.msra.gmra.mrb[0].mxu0 %v278_v34 }
 0x1b1   : > { %v417_v44 = vpop.f32.mrb[0].mxu0 }
 0x1b2   : > { %v418_v45 = vadd.f32 %v843_v43, %v417_v44  ;;  %v419_v46 = vpop.f32.mrb[1].mxu0 }
 0x1b3   : > { %v420_v47 = vpop.f32.mrb[2].mxu0 }
 0x1b4   : > { %v421_v48 = vadd.f32 %v843_v43, %v420_v47  ;;  %v422_v49 = vpop.f32.mrb[3].mxu0  ;;  %v424_v50 = vmax.f32 %v418_v45, 0.0 }
 0x1b6   : > { %v425_v51 = vmax.f32 %v421_v48, 0.0 }
 0x1b8   : > { %v426_v52 = vpack.c.bf16 %v425_v51, %v424_v50 }
 0x1ba   : > { %v429_v53 = vshrl.u32 %v426_v52, 16  ;;  %669 = vmatprep.mubr.bf16.mxu1 %v426_v52  ;;  %v432_v55 = vshll.u32 %v426_v52, 16 }
 0x1bc   : > { %v431_v54 = vrot.slane %v429_v53, 7  ;;  %v437_v1 = vrot.slane %v432_v55, 1 }
 0x1be   : > { %v434_v56 = vor.u32 %v432_v55, %v431_v54  ;;  %v438_v3 = vor.u32 %v437_v1, %v429_v53 }
 0x1c0   : > { %v436_v58 = vsel %vm1459_vm6, 0, %v434_v56  ;;  %v440_v4 = vsel %vm1442_vm2, %v438_v3, 0 }
 0x1c1   : > { %670 = vmatmul.mubr.bf16.vlgmr.msra.gmra.mrb[0].mxu1 %v436_v58 }
 0x1c2   : > { %921 = vmatpush3.bf16.msra.mxu1 %v1044_v57  ;;  %936 = vmatprep.mubr.msk.bf16.mxu1 %vm1218_vm7, %v1217_v42 }
 0x1c3   : > { %922 = vmatprep.subr.bf16.mxu1 %v1217_v42 }
 0x1c6   : > { %923 = vmatpush3.bf16.msra.mxu1 %v1045_v59 }
 0x1c7   : > { %924 = vmatprep.subr.bf16.mxu1 %v1217_v42 }
 0x1ca   : > { %925 = vmatpush3.bf16.msra.mxu1 %v1046_v60 }
 0x1cb   : > { %926 = vmatprep.subr.bf16.mxu1 %v1217_v42 }
 0x1ce   : > { %927 = vmatpush3.bf16.msra.mxu1 %v1047_v61 }
 0x1cf   : > { %928 = vmatprep.subr.bf16.mxu1 %v1217_v42 }
 0x1d2   : > { %929 = vmatpush3.bf16.msra.mxu1 %v1048_v62 }
 0x1d3   : > { %930 = vmatprep.subr.bf16.mxu1 %v1217_v42 }
 0x1d6   : > { %931 = vmatpush3.bf16.msra.mxu1 %v1049_v63 }
 0x1d7   : > { %932 = vmatprep.subr.bf16.mxu1 %v1217_v42 }
 0x1da   : > { %933 = vmatpush3.bf16.msra.mxu1 %v1050_v0 }
 0x1db   : > { %934 = vmatprep.subr.bf16.mxu1 %v1217_v42 }
 0x1de   : > { %935 = vmatpush3.bf16.msra.mxu1 %v1051_v2 }
 0x1e1   : > { %937 = vmatmul.mubr.bf16.vlgmr.msra.gmra.mrb[4].mxu1 %v440_v4 }
 0x294   : > { %v905_v5 = vpop.f32.mrb[0].mxu1 }
 0x295   : > { %v906_v6 = vpop.f32.mrb[1].mxu1 }
 0x296   : > { %v907_v7 = vadd.f32 %v906_v6, %v905_v5  ;;  %v908_v9 = vpop.f32.mrb[2].mxu1 }
 0x297   : > { %v909_v10 = vpop.f32.mrb[3].mxu1 }
 0x298   : > { %v910_v11 = vadd.f32 %v909_v10, %v908_v9  ;;  %v672_v13 = vadd.f32 %v907_v7, %v857_v12 }
 0x29a   : > { %v675_v16 = vadd.f32 %v910_v11, %v857_v12 }
 0x2b4   : > { %v712_v14 = vpop.f32.mrb[4].mxu1 }
 0x2b5   : > { %v713_v8 = vadd.f32 %v712_v14, %v672_v13  ;;  %v938_v15 = vpop.f32.mrb[5].mxu1 }
 0x2b6   : > { %v715_v17 = vpop.f32.mrb[6].mxu1 }
 0x2b7   : > { %v719_v18 = vmax.f32 %v713_v8, 0.0  ;;  %v716_v19 = vadd.f32 %v715_v17, %v675_v16  ;;  %v939_v20 = vpop.f32.mrb[7].mxu1 }
 0x2b9   : > { %721 = vst [vmem:[%s244_s25] sm:$0xff] %v719_v18  ;;  %v720_v21 = vmax.f32 %v716_v19, 0.0 }
 0x2bb   : > { %722 = vst [vmem:[%s244_s25 + $0x8] sm:$0xff] %v720_v21 }
 0x2bc   : > { %1151 = shalt.err (!%p1148_p1)
}
 0x2bd   : > { %s1152_s23 = scalar_lea.hbm %s1483_s5, 256  ;;  %s1156_s12 = scalar_lea.hbm %s1531_s4, 512 }
 0x2be   : > { %p1153_p13 = scmp.ne.s32.totalorder %s1483_s5, %s1152_s23  ;;  %p1157_p4 = scmp.lt.u32.totalorder %s1483_s5, %s1531_s4 }
 0x2bf   : > { %p1158_p5 = scmp.lt.u32.totalorder %s1156_s12, %s1152_s23  ;;  %p1160_p8 = scmp.lt.u32.totalorder %s1152_s23, %s1483_s5 }
 0x2c0   : > { %p1154_p6 = pnand %p1153_p13, %p1549_p0 }
 0x2c1   : > { %p1159_p11 = por %p1158_p5, %p1157_p4 }
 0x2c2   : > { %p1155_p10 = pneg %p1154_p6 }
 0x2c3   : > { %p1161_p2 = por %p1160_p8, %p1159_p11 }
 0x2c5   : > { %p1162_p3 = pnand %p1161_p2, %p1155_p10 }
 0x2c7   : > { %1165 = shalt.err (!%p1162_p3)
}
 0x2c8   : > { %s1220_s25 = smov 128   ;;  %s1221_s27 = smov 8  }
 0x2c9   : > { %950 = dma.vmem_to_hbm [thread:$0]  (%p1549_p0), %s1478_s7, 256, %s1483_s5, %s724_s9, %s1220_s25, %s1220_s25, %s1221_s27  }
 0x2ca PF: > { %s752_s20 = sand.u32 1, %s1196_s15   ;;  %p1550_p7 = scmp.ne.s32.totalorder %s1536_s22, 0 }
 0x2cb   : > { %p1551_p9 = scmp.ge.s32.totalorder %s1208_s18, 2  ;;  %s753_s29 = scalar_lea.sflag [#allocation4], %s752_s20 }
 0x2cd   : > { %p964_p12 = pnand %p1551_p9, %p1550_p7 }
 0x2cf   : > { %1191 = dma.done.wait (!%p964_p12), %s753_s29, 256  }
 0x2d0   : > { %1193 = vsyncadd (!%p964_p12), %s753_s29, 4294967040  ;;  %p18_p1 = scmp.ge.s32.totalorder %s1363_s26, 4   ;;  %s1552_s15 = smov %s1200_s16 }
 0x2d1   : > { %s1553_s16 = smov %s1204_s17  ;;  %s1554_s17 = smov %s1379_s14 }
 0x2d2   : > { %s1555_s18 = smov %s1363_s26  ;;  %20 = sbr.rel (!%p18_p1) target bundleno = 6 (0x6), region = 89 }
 0x2d9   :  { %758 = vsyncpa [#allocation3], 1 }
 0x2da   :  { %760 = vsyncpa [#allocation3 + $0x1], 1 }
 0x2db   :  { %761 = vsyncpa [#allocation6], 1 }
 0x2dc   :  { %762 = vsyncpa [#allocation4], 1 }
 0x2dd   :  { %764 = vsyncpa [#allocation4 + $0x1], 1 }

</bundles_post_ra>
